<compile_context>
chip_gen: v7x
topology: tpu7x:2x2x1
jax: 0.10.0
libtpu: 0.0.40
codegen_flags: <defaults>
</compile_context>

<pallas_src>
import jax
import jax.numpy as jnp
from jax import lax
from jax.experimental import pallas as pl
from jax.experimental.pallas import tpu as pltpu


def _round_up(x: int, m: int) -> int:
    return ((x + m - 1) // m) * m


def _pick_tile(dim: int, target: int, align: int):
    """Pick (tile, padded_dim): tile % align == 0 (or tile == padded_dim),
    tile divides padded_dim, and padding is kept minimal (per perf review)."""
    target = max(align, (target // align) * align)
    p = _round_up(dim, align)
    if p <= target:
        return p, p                          # single block, minimal padding
    # Largest aligned divisor of the minimally-padded size that is <= target.
    div = 0
    t = target
    while t >= align:
        if p % t == 0:
            div = t
            break
        t -= align
    if 2 * div >= target:
        return div, p                        # near-target tile, zero extra padding
    if p <= 2 * target:
        return p, p                          # one big block beats 30-60% padding
    p_tgt = _round_up(dim, target)
    if div >= align and (p_tgt - p) * 8 > p:
        return div, p                        # padding to `target` would waste >12.5%
    return target, p_tgt                     # small padding, full-size tile


def linear_kernel(x_ref, w_ref, b_ref, o_ref, acc_ref):
    # x_ref: (tm, tk) activations
    # w_ref: (tk, tn) weight tile (pre-transposed [K, N] layout)
    # b_ref: (1, tn)  bias tile (f32)
    # o_ref: (tm, tn) output tile
    # acc_ref: (tm, tn) f32 accumulator scratch (persists across the K axis)
    k = pl.program_id(2)

    # Plain "NN" contraction: no per-tile weight transpose feeding the MXU.
    # Default precision; pass an explicit precision if bit-matching
    # Precision.HIGHEST is ever required (1e-3-level accuracy is kept).
    partial = lax.dot_general(
        x_ref[...],
        w_ref[...],
        dimension_numbers=(((1,), (0,)), ((), ())),
        preferred_element_type=jnp.float32,
    )

    @pl.when(k == 0)
    def _():
        acc_ref[...] = partial              # direct write: no zero-init + add

    @pl.when(k > 0)
    def _():
        acc_ref[...] += partial

    @pl.when(k == pl.num_programs(2) - 1)
    def _():
        out = acc_ref[...] + b_ref[...].astype(jnp.float32)
        o_ref[...] = out.astype(o_ref.dtype)


def prepare_linear_params(weight, bias, mxu_dtype=None):
    """One-time (outside the training-step hot path) parameter prep:
    PyTorch weight [N, K] -> [K, N], optionally cast to the MXU dtype."""
    w_kn = jnp.asarray(weight).T
    if mxu_dtype is not None:
        w_kn = w_kn.astype(mxu_dtype)
    return w_kn, jnp.asarray(bias)


def linear_forward(x, weight_kn, bias, *, tm=512, tn=512, tk=512,
                   mxu_dtype=None, input_buffers=2):
    """torch.nn.Linear forward: returns x @ weight_kn + bias.

    x:         [M, K]
    weight_kn: [K, N]  (PyTorch weight [N, K] pre-transposed once via
               prepare_linear_params, NOT transposed in the hot path)
    bias:      [N]
    mxu_dtype: optional MXU operand dtype (e.g. jnp.bfloat16); accumulation
               and bias add stay in f32, output keeps x's original dtype.
    """
    M, K = x.shape
    K2, N = weight_kn.shape
    assert K == K2 and bias.shape == (N,)
    out_dtype = x.dtype

    compute_dtype = jnp.dtype(mxu_dtype) if mxu_dtype is not None else jnp.dtype(x.dtype)
    if x.dtype != compute_dtype:
        x = x.astype(compute_dtype)
    if weight_kn.dtype != compute_dtype:
        weight_kn = weight_kn.astype(compute_dtype)

    # Hardware-minimum alignment: lane axis 128; sublane 8 (4B) / 16 (2B) / 32 (1B).
    sub_align = {4: 8, 2: 16, 1: 32}.get(compute_dtype.itemsize, 8)

    tm, Mp = _pick_tile(M, tm, sub_align)
    tn, Np = _pick_tile(N, tn, 128)
    tk, Kp = _pick_tile(K, tk, 128)

    # v7x shards the "parallel" grid axes over 2 TensorCores: make sure there
    # are at least 2 (i, j) blocks when the problem allows it.
    if (Mp // tm) * (Np // tn) < 2:
        if tn >= 256 and (tn // 2) % 128 == 0:
            tn //= 2
        elif tm >= 2 * sub_align and (tm // 2) % sub_align == 0:
            tm //= 2

    # Minimal zero-padding (zero K padding contributes nothing to the dot;
    # padded M/N rows/cols are sliced off afterwards).
    x_p = x if (Mp == M and Kp == K) else jnp.pad(x, ((0, Mp - M), (0, Kp - K)))
    w_p = weight_kn if (Kp == K and Np == N) else jnp.pad(
        weight_kn, ((0, Kp - K), (0, Np - N)))
    b_p = (bias if Np == N else jnp.pad(bias, (0, Np - N))).reshape(1, Np)

    grid = (Mp // tm, Np // tn, Kp // tk)
    in_itemsize = compute_dtype.itemsize
    out_itemsize = jnp.dtype(out_dtype).itemsize

    def in_spec(shape, index_map):
        # Optional deeper input pipelining if the x/W DMA is exposed.
        if input_buffers != 2:
            return pl.BlockSpec(shape, index_map,
                                pipeline_mode=pl.Buffered(input_buffers))
        return pl.BlockSpec(shape, index_map)

    # VMEM footprint estimate (double/triple-buffered inputs + output + acc).
    bufs = max(2, input_buffers)
    vmem_bytes = (bufs * (tm * tk + tk * tn) * in_itemsize
                  + 2 * tm * tn * out_itemsize
                  + tm * tn * 4
                  + bufs * tn * 4)
    cp = dict(dimension_semantics=("parallel", "parallel", "arbitrary"))
    if vmem_bytes > (12 << 20):
        # Stay well inside v7x's 64 MiB physical VMEM (cap at 48 MiB).
        cp["vmem_limit_bytes"] = int(min(vmem_bytes + (4 << 20), 48 << 20))

    out = pl.pallas_call(
        linear_kernel,
        out_shape=jax.ShapeDtypeStruct((Mp, Np), out_dtype),
        grid_spec=pltpu.PrefetchScalarGridSpec(
            num_scalar_prefetch=0,
            grid=grid,
            in_specs=[
                in_spec((tm, tk), lambda i, j, k: (i, k)),       # x
                in_spec((tk, tn), lambda i, j, k: (k, j)),       # weight [K, N]
                pl.BlockSpec((1, tn), lambda i, j, k: (0, j)),   # bias
            ],
            out_specs=pl.BlockSpec((tm, tn), lambda i, j, k: (i, j)),
            scratch_shapes=[pltpu.VMEM((tm, tn), jnp.float32)],
        ),
        compiler_params=pltpu.CompilerParams(**cp),
        cost_estimate=pl.CostEstimate(
            flops=2 * Mp * Np * Kp,
            transcendentals=0,
            # x re-read once per N tile, W once per M tile (re-streaming).
            bytes_accessed=(Mp * Kp * (Np // tn) + Kp * Np * (Mp // tm)) * in_itemsize
                           + Mp * Np * out_itemsize
                           + Np * jnp.dtype(bias.dtype).itemsize,
        ),
    )(x_p, w_p, b_p)

    if (Mp, Np) != (M, N):
        out = out[:M, :N]
    return out


if __name__ == "__main__":
    key = jax.random.PRNGKey(0)

    def make_case(k, batch, input_size, output_size):
        kx, kw, kb = jax.random.split(k, 3)
        bound = 1.0 / (input_size ** 0.5)
        x = jax.random.normal(kx, (batch, input_size), dtype=jnp.float32)
        weight = jax.random.uniform(
            kw, (output_size, input_size), minval=-bound, maxval=bound,
            dtype=jnp.float32)
        bias = jax.random.uniform(
            kb, (output_size,), minval=-bound, maxval=bound, dtype=jnp.float32)
        return x, weight, bias

    k1, k2 = jax.random.split(key)

    # Case 1: small shapes consistent with the module (single padded tile).
    x, w, b = make_case(k1, batch=8, input_size=32, output_size=16)
    w_kn, b1 = prepare_linear_params(w, b)          # one-time weight transpose
    out = linear_forward(x, w_kn, b1)
    jax.block_until_ready(out)
    ref = jnp.dot(x, w.T, precision=lax.Precision.HIGHEST) + b
    assert out.shape == ref.shape
    assert jnp.allclose(out, ref, atol=1e-3, rtol=1e-3), \
        float(jnp.max(jnp.abs(out - ref)))

    # Case 2: non-power-of-two shapes with zero extra padding under the new
    # heuristic (K=640 -> tk=128 x 5 K-steps, N=384 -> tn=384); exercises the
    # multi-step accumulation and the bias-added-once finalize.
    x2, w2, b2 = make_case(k2, batch=128, input_size=640, output_size=384)
    w2_kn, b2p = prepare_linear_params(w2, b2)
    out2 = linear_forward(x2, w2_kn, b2p, tk=256)
    jax.block_until_ready(out2)
    ref2 = jnp.dot(x2, w2.T, precision=lax.Precision.HIGHEST) + b2
    assert out2.shape == ref2.shape
    assert jnp.allclose(out2, ref2, atol=2e-3, rtol=2e-3), \
        float(jnp.max(jnp.abs(out2 - ref2)))

    # Case 3: bf16 MXU operands with f32 accumulation (throughput lever).
    w3_kn, b3 = prepare_linear_params(w2, b2, mxu_dtype=jnp.bfloat16)
    out3 = linear_forward(x2, w3_kn, b3, mxu_dtype=jnp.bfloat16)
    jax.block_until_ready(out3)
    assert out3.shape == ref2.shape
    assert jnp.allclose(out3, ref2, atol=3e-2, rtol=3e-2), \
        float(jnp.max(jnp.abs(out3 - ref2)))

    print("KERNEL_OK")
</pallas_src>

<mosaic_0001>
module attributes {stable_mosaic.version = 11 : i64} {
  func.func @linear_kernel(%arg0: i32, %arg1: i32, %arg2: i32, %arg3: memref<8x128xf32, #tpu.memory_space<vmem>>, %arg4: memref<128x128xf32, #tpu.memory_space<vmem>>, %arg5: memref<1x128xf32, #tpu.memory_space<vmem>>, %arg6: memref<8x128xf32, #tpu.memory_space<vmem>>, %arg7: memref<8x128xf32, #tpu.memory_space<vmem>>) attributes {dimension_semantics = [#tpu.dimension_semantics<parallel>, #tpu.dimension_semantics<parallel>, #tpu.dimension_semantics<arbitrary>], iteration_bounds = array<i64: 1, 1, 1>, scalar_prefetch = 0 : i64, scratch_operands = 1 : i64, tpu.core_type = #tpu.core_type<tc>, window_params = [{transform_indices = @transform_0, window_bounds = array<i64: 8, 128>}, {transform_indices = @transform_1, window_bounds = array<i64: 128, 128>}, {transform_indices = @transform_2, window_bounds = array<i64: 1, 128>}, {transform_indices = @transform_3, window_bounds = array<i64: 8, 128>}]} {
    %c0 = arith.constant 0 : index
    %c0_0 = arith.constant 0 : index
    %0 = vector.load %arg3[%c0, %c0_0] : memref<8x128xf32, #tpu.memory_space<vmem>>, vector<8x128xf32>
    %c0_1 = arith.constant 0 : index
    %c0_2 = arith.constant 0 : index
    %1 = vector.load %arg4[%c0_1, %c0_2] : memref<128x128xf32, #tpu.memory_space<vmem>>, vector<128x128xf32>
    %cst = arith.constant dense<0.000000e+00> : vector<8x128xf32>
    %2 = tpu.matmul %0, %1, %cst {dimension_numbers = #tpu.dot_dimension_numbers<[1], [0], [0], [1], [0, 0, 1, 1], [], []>} : vector<8x128xf32>, vector<128x128xf32>, vector<8x128xf32> -> vector<8x128xf32>
    %c0_i32 = arith.constant 0 : i32
    %3 = arith.cmpi eq, %arg2, %c0_i32 : i32
    %4 = arith.extui %3 : i1 to i32
    %c0_i32_3 = arith.constant 0 : i32
    %5 = arith.cmpi ne, %4, %c0_i32_3 : i32
    scf.if %5 {
      %c0_8 = arith.constant 0 : index
      %c0_9 = arith.constant 0 : index
      %12 = vector.load %arg7[%c0_8, %c0_9] : memref<8x128xf32, #tpu.memory_space<vmem>>, vector<8x128xf32>
      tpu.vector_store %arg7[%c0_8, %c0_9], %2 {strides = array<i32>} : memref<8x128xf32, #tpu.memory_space<vmem>>, vector<8x128xf32>,
    } else {
    }
    %c0_i32_4 = arith.constant 0 : i32
    %6 = arith.cmpi sgt, %arg2, %c0_i32_4 : i32
    %7 = arith.extui %6 : i1 to i32
    %c0_i32_5 = arith.constant 0 : i32
    %8 = arith.cmpi ne, %7, %c0_i32_5 : i32
    scf.if %8 {
      %c0_8 = arith.constant 0 : index
      %c0_9 = arith.constant 0 : index
      %12 = vector.load %arg7[%c0_8, %c0_9] : memref<8x128xf32, #tpu.memory_space<vmem>>, vector<8x128xf32>
      %13 = arith.addf %12, %2 : vector<8x128xf32>
      %c0_10 = arith.constant 0 : index
      %c0_11 = arith.constant 0 : index
      %14 = vector.load %arg7[%c0_10, %c0_11] : memref<8x128xf32, #tpu.memory_space<vmem>>, vector<8x128xf32>
      tpu.vector_store %arg7[%c0_10, %c0_11], %13 {strides = array<i32>} : memref<8x128xf32, #tpu.memory_space<vmem>>, vector<8x128xf32>,
    } else {
    }
    %c0_i32_6 = arith.constant 0 : i32
    %9 = arith.cmpi eq, %arg2, %c0_i32_6 : i32
    %10 = arith.extui %9 : i1 to i32
    %c0_i32_7 = arith.constant 0 : i32
    %11 = arith.cmpi ne, %10, %c0_i32_7 : i32
    scf.if %11 {
      %c0_8 = arith.constant 0 : index
      %c0_9 = arith.constant 0 : index
      %12 = vector.load %arg7[%c0_8, %c0_9] : memref<8x128xf32, #tpu.memory_space<vmem>>, vector<8x128xf32>
      %c0_10 = arith.constant 0 : index
      %c0_11 = arith.constant 0 : index
      %13 = vector.load %arg5[%c0_10, %c0_11] : memref<1x128xf32, #tpu.memory_space<vmem>>, vector<1x128xf32>
      %14 = vector.broadcast %13 : vector<1x128xf32> to vector<8x128xf32>
      %15 = arith.addf %12, %14 : vector<8x128xf32>
      %c0_12 = arith.constant 0 : index
      %c0_13 = arith.constant 0 : index
      %16 = vector.load %arg6[%c0_12, %c0_13] : memref<8x128xf32, #tpu.memory_space<vmem>>, vector<8x128xf32>
      tpu.vector_store %arg6[%c0_12, %c0_13], %15 {strides = array<i32>} : memref<8x128xf32, #tpu.memory_space<vmem>>, vector<8x128xf32>,
    } else {
    }
    return
  }
  func.func @transform_0(%arg0: i32, %arg1: i32, %arg2: i32) -> (i32, i32) {
    %c0_i32 = arith.constant 0 : i32
    return %arg0, %arg2 : i32, i32
  }
  func.func @transform_1(%arg0: i32, %arg1: i32, %arg2: i32) -> (i32, i32) {
    %c0_i32 = arith.constant 0 : i32
    return %arg2, %arg1 : i32, i32
  }
  func.func @transform_2(%arg0: i32, %arg1: i32, %arg2: i32) -> (i32, i32) {
    %c0_i32 = arith.constant 0 : i32
    %c0_i32_0 = arith.constant 0 : i32
    return %c0_i32, %arg1 : i32, i32
  }
  func.func @transform_3(%arg0: i32, %arg1: i32, %arg2: i32) -> (i32, i32) {
    %c0_i32 = arith.constant 0 : i32
    return %arg0, %arg1 : i32, i32
  }
}

</mosaic_0001>

<bundles_post_ra>
// kernel: tpu_custom_call.1
= control target key start
LH: loop header
LB: loop body
LE: loop exit
PB: predicated region body
PF: predicated region fallthrough
CT: control target
= control target key end

     0   :  { %8 = vsyncpa [#allocation4], 0  ;;  %s400_s0 = inlined_call_operand.hbm [shape: f32[8,128], index: 0, kind: input, shape index: {}]   ;;  %s401_s1 = inlined_call_operand.hbm [shape: f32[128,128], index: 1, kind: input, shape index: {}]   ;;  %s402_s2 = inlined_call_operand.vmem [shape: f32[1,128], index: 2, kind: input, shape index: {}]   ;;  %s403_s3 = inlined_call_operand.hbm [shape: f32[8,128], index: 3, kind: output, shape index: {}]  }
   0x1   :  { %9 = vsyncpa [#allocation7], 0 }
   0x2   :  { %10 = vsyncpa [#allocation5], 0  ;;  %s326_s12 = smov [#allocation3]   ;;  %s327_s14 = smov [#allocation6]  }
   0x3   :  { %s17_s13 = sshll.u32 %s326_s12, 4  ;;  %s26_s15 = sshll.u32 %s327_s14, 4  ;;  %s18_s13 = int_to_ptr.vmem [resolvable:$true] %s17_s13  ;;  %s354_s15 = int_to_ptr.vmem [resolvable:$true] %s26_s15 }
   0x4   :  { %s254_s18 = scalar_lea.hbm %s400_s0, 128 }
   0x5   :  { %p255_p0 = scmp.ne.s32.totalorder %s400_s0, %s254_s18  ;;  %p258_p1 = scmp.lt.u32.totalorder %s254_s18, %s400_s0 }
   0x7   :  { %p260_p2 = pnand %p258_p1, %p255_p0 }
   0x9   :  { %263 = shalt.err (!%p260_p2)
}
   0xa   :  { %s264_s23 = scalar_lea.vmem %s18_s13, 128  ;;  %p269_p4 = scmp.lt.s32.totalorder %s18_s13, %s18_s13 }
   0xb   :  { %p265_p3 = scmp.ne.s32.totalorder %s18_s13, %s264_s23  ;;  %p270_p5 = scmp.lt.s32.totalorder %s264_s23, %s264_s23 }
   0xd   :  { %p271_p6 = por %p270_p5, %p269_p4 }
   0xf   :  { %p272_p7 = pnand %p271_p6, %p265_p3 }
  0x11   :  { %275 = shalt.err (!%p272_p7)
}
  0x12   :  { %20 = dma.hbm_to_vmem [thread:$0]  %s400_s0, 128, %s18_s13, [#allocation4]  }
  0x13   :  { %s276_s28 = scalar_lea.hbm %s401_s1, 2048 }
  0x14   :  { %p277_p8 = scmp.ne.s32.totalorder %s401_s1, %s276_s28  ;;  %p280_p9 = scmp.lt.u32.totalorder %s276_s28, %s401_s1 }
  0x16   :  { %p282_p10 = pnand %p280_p9, %p277_p8 }
  0x18   :  { %285 = shalt.err (!%p282_p10)
}
  0x19   :  { %s286_s6 = scalar_lea.vmem %s354_s15, 2048  ;;  %p291_p12 = scmp.lt.s32.totalorder %s354_s15, %s354_s15 }
  0x1a   :  { %p287_p11 = scmp.ne.s32.totalorder %s354_s15, %s286_s6  ;;  %p292_p13 = scmp.lt.s32.totalorder %s286_s6, %s286_s6 }
  0x1c   :  { %p293_p0 = por %p292_p13, %p291_p12 }
  0x1e   :  { %p294_p1 = pnand %p293_p0, %p287_p11 }
  0x20   :  { %297 = shalt.err (!%p294_p1)
}
  0x21   :  { %s328_s0 = smov 128   ;;  %s329_s7 = smov 8  }
  0x22   :  { %32 = dma.hbm_to_vmem [thread:$0]  %s401_s1, 2048, %s354_s15, [#allocation7], %s328_s0, %s328_s0, %s329_s7  }
  0x23   :  { %320 = dma.done.wait [#allocation4], 128  }
  0x24   :  { %321 = vsyncadd [#allocation4], 4294967168 }
  0x25   :  { %322 = dma.done.wait [#allocation7], 2048  }
  0x26   :  { %323 = vsyncadd [#allocation7], 4294965248  ;;  %v330_v0 = vmov 0.0|0.0   ;;  %vm331_vm0 = vmmov 0   ;;  %v332_v1 = vmov 0.0   ;;  %v42_v2 = vld [vmem:[#allocation6] sm:$0xff] }
  0x27   :  { %222 = vmatprep.subr.bf16.mxu0 %v330_v0  ;;  %219 = vmatprep.mubr.msk.f32.mxu0 %vm331_vm0, %v332_v1  ;;  %v43_v3 = vld [vmem:[#allocation6 + $0x8] sm:$0xff]  ;;  %v44_v4 = vld [vmem:[#allocation6 + $0x10] sm:$0xff]  ;;  %v45_v6 = vld [vmem:[#allocation6 + $0x18] sm:$0xff]  ;;  %s333_s11 = smov [#allocation8]  }
  0x28   :  { %v223_v5 = vpack.c.bf16 %v43_v3, %v42_v2  ;;  %v226_v7 = vpack.c.bf16 %v45_v6, %v44_v4  ;;  %v46_v8 = vld [vmem:[#allocation6 + $0x20] sm:$0xff]  ;;  %v47_v9 = vld [vmem:[#allocation6 + $0x28] sm:$0xff]  ;;  %v48_v11 = vld [vmem:[#allocation6 + $0x30] sm:$0xff]  ;;  %s159_s12 = sshll.u32 %s333_s11, 4  ;;  %s160_s12 = int_to_ptr.vmem [resolvable:$true] %s159_s12 }
  0x29   :  { %v229_v10 = vpack.c.bf16 %v47_v9, %v46_v8  ;;  %v49_v12 = vld [vmem:[#allocation6 + $0x38] sm:$0xff]  ;;  %v50_v14 = vld [vmem:[#allocation6 + $0x40] sm:$0xff]  ;;  %v51_v15 = vld [vmem:[#allocation6 + $0x48] sm:$0xff]  ;;  %s298_s13 = scalar_lea.vmem %s160_s12, 128  ;;  %p303_p3 = scmp.lt.s32.totalorder %s160_s12, %s160_s12 }
  0x2a   :  { %224 = vmatpush3.bf16.msra.mxu0 %v223_v5  ;;  %v232_v13 = vpack.c.bf16 %v49_v12, %v48_v11  ;;  %v235_v16 = vpack.c.bf16 %v51_v15, %v50_v14  ;;  %v52_v17 = vld [vmem:[#allocation6 + $0x50] sm:$0xff]  ;;  %v53_v18 = vld [vmem:[#allocation6 + $0x58] sm:$0xff]  ;;  %v54_v20 = vld [vmem:[#allocation6 + $0x60] sm:$0xff]  ;;  %p299_p2 = scmp.ne.s32.totalorder %s160_s12, %s298_s13  ;;  %p304_p4 = scmp.lt.s32.totalorder %s298_s13, %s298_s13 }
  0x2b   :  { %225 = vmatprep.subr.bf16.mxu0 %v330_v0  ;;  %v238_v19 = vpack.c.bf16 %v53_v18, %v52_v17  ;;  %v55_v21 = vld [vmem:[#allocation6 + $0x68] sm:$0xff]  ;;  %v56_v23 = vld [vmem:[#allocation6 + $0x70] sm:$0xff]  ;;  %v57_v24 = vld [vmem:[#allocation6 + $0x78] sm:$0xff] }
  0x2c   :  { %v241_v22 = vpack.c.bf16 %v55_v21, %v54_v20  ;;  %v244_v25 = vpack.c.bf16 %v57_v24, %v56_v23  ;;  %v41_v26 = vld [vmem:[#allocation3] sm:$0xff]  ;;  %p305_p5 = por %p304_p4, %p303_p3 }
  0x2d   :  { %v169_v27 = vld [vmem:[%s402_s2] ss:$0 sm:$0xff] }
  0x2e   :  { %227 = vmatpush3.bf16.msra.mxu0 %v226_v7  ;;  %p306_p6 = pnand %p305_p5, %p299_p2 }
  0x2f   :  { %228 = vmatprep.subr.bf16.mxu0 %v330_v0 }
  0x32   :  { %230 = vmatpush3.bf16.msra.mxu0 %v229_v10 }
  0x33   :  { %231 = vmatprep.subr.bf16.mxu0 %v330_v0 }
  0x36   :  { %233 = vmatpush3.bf16.msra.mxu0 %v232_v13 }
  0x37   :  { %234 = vmatprep.subr.bf16.mxu0 %v330_v0 }
  0x3a   :  { %236 = vmatpush3.bf16.msra.mxu0 %v235_v16 }
  0x3b   :  { %237 = vmatprep.subr.bf16.mxu0 %v330_v0 }
  0x3e   :  { %239 = vmatpush3.bf16.msra.mxu0 %v238_v19 }
  0x3f   :  { %240 = vmatprep.subr.bf16.mxu0 %v330_v0 }
  0x42   :  { %242 = vmatpush3.bf16.msra.mxu0 %v241_v22 }
  0x43   :  { %243 = vmatprep.subr.bf16.mxu0 %v330_v0 }
  0x46   :  { %245 = vmatpush3.bf16.msra.mxu0 %v244_v25 }
  0x49   :  { %220 = vmatmul.mubr.f32.vlgmr.msra.gmra.mrb[0].mxu0 %v41_v26 }
 0x11c   :  { %v124_v28 = vpop.f32.mrb[0].mxu0 }
 0x11d   :  { %v151_v29 = vadd.f32 %v169_v27, %v124_v28  ;;  %v221_v30 = vpop.f32.mrb[1].mxu0 }
 0x11f   :  { %152 = vst [vmem:[#allocation8] sm:$0xff] %v151_v29 }
 0x120   :  { %309 = shalt.err (!%p306_p6)
}
 0x121   :  { %s310_s16 = scalar_lea.hbm %s403_s3, 128 }
 0x122   :  { %p311_p7 = scmp.ne.s32.totalorder %s403_s3, %s310_s16  ;;  %p314_p8 = scmp.lt.u32.totalorder %s310_s16, %s403_s3 }
 0x124   :  { %p316_p9 = pnand %p314_p8, %p311_p7 }
 0x126   :  { %319 = shalt.err (!%p316_p9)
}
 0x127   :  { %162 = dma.vmem_to_hbm [thread:$0]  %s160_s12, 128, %s403_s3, [#allocation5]  }
 0x128   :  { %324 = dma.done.wait [#allocation5], 128  }
 0x129   :  { %325 = vsyncadd [#allocation5], 4294967168 }
 0x12a   :  { %166 = vsyncpa [#allocation4], 1 }
 0x12b   :  { %167 = vsyncpa [#allocation7], 1 }
 0x12c   :  { %168 = vsyncpa [#allocation5], 1 }

</bundles_post_ra>
